<compile_context>
chip_gen: v7x
topology: tpu7x:2x2x1
jax: 0.10.0
libtpu: 0.0.40
codegen_flags: <defaults>
</compile_context>

<pallas_src>
import jax
import jax.numpy as jnp
from jax import lax
from jax.experimental import pallas as pl
from jax.experimental.pallas import tpu as pltpu


def _round_up(x, m):
    return ((x + m - 1) // m) * m


def _conv_stats_kernel(p_ref, w_ref, y_ref, sum_ref, ssq_ref):
    """y(Coutp, tm) = W(Coutp, K) @ patches(K, tm) in one MXU step (f32 acc),
    plus per-tile per-channel sum / sum-of-squares (f32), chunked epilogue."""
    y = jnp.dot(w_ref[...], p_ref[...], preferred_element_type=jnp.float32)
    y_ref[...] = y.astype(y_ref.dtype)          # bf16 store, lane-dense

    coutp, tm = y.shape
    ch = min(512, tm)
    s = jnp.zeros((coutp, 1), jnp.float32)
    q = jnp.zeros((coutp, 1), jnp.float32)
    for c0 in range(0, tm, ch):                 # static, small unroll
        yc = y[:, c0:c0 + ch]
        s = s + jnp.sum(yc, axis=1, keepdims=True)
        q = q + jnp.sum(yc * yc, axis=1, keepdims=True)
    sum_ref[...] = s
    ssq_ref[...] = q


def _bn_relu_kernel(y_ref, scale_ref, shift_ref, o_ref):
    """Folded BatchNorm (scale/shift) + ReLU, elementwise, lane-dense tiles."""
    y = y_ref[...].astype(jnp.float32)
    o_ref[...] = jnp.maximum(y * scale_ref[...] + shift_ref[...], 0.0)


def basic_conv(x, weight, gamma, beta, *, stride=1, padding=0, dilation=1,
               groups=1, eps=1e-5, tm_target=2048):
    """Forward pass of BasicConv.  x: [N, Cin, H, W] float32 (NCHW)."""
    assert groups == 1  # TODO(synk): grouped convolution not implemented
    N, Cin, H, W = x.shape
    Cout, _, KH, KW = weight.shape

    OH = (H + 2 * padding - dilation * (KH - 1) - 1) // stride + 1
    OW = (W + 2 * padding - dilation * (KW - 1) - 1) // stride + 1
    OHW = OH * OW
    M = N * OHW
    K = KH * KW * Cin
    Coutp = _round_up(Cout, 8)

    # ---- tile selection (lane-dense per-image M, single full-K step) ----
    ohw128 = _round_up(OHW, 128)
    tm = min(tm_target, ohw128)
    tm = max(128, (tm // 128) * 128)
    if N == 1 and ohw128 >= 256:                # keep >= 2 parallel grid steps
        tm = min(tm, max(128, (ohw128 // 2) // 128 * 128))

    def _a_bytes(t):   # streaming blocks double-buffered + resident weight
        return (2 * (_round_up(K, 16) * t * 2 + Coutp * t * 2)
                + Coutp * _round_up(K, 128) * 2
                + 4 * Coutp * 128 * 4)
    while tm > 128 and _a_bytes(tm) > (40 << 20):   # v7x 64 MiB VMEM budget
        tm -= 128

    OHWp = _round_up(OHW, tm)
    n_m = OHWp // tm

    # ---- im2col (wrapper glue, NCHW slices only, bf16), per-image layout ----
    # TODO(synk): replace with in-kernel tap accumulation (manual DMA of shifted
    #             windows) to avoid materializing KH*KW x the input in HBM.
    xb = jnp.pad(x.astype(jnp.bfloat16),
                 ((0, 0), (0, 0), (padding, padding), (padding, padding)))
    taps = []
    for kh in range(KH):
        for kw in range(KW):
            h0, w0 = kh * dilation, kw * dilation
            sl = xb[:, :,
                    h0: h0 + (OH - 1) * stride + 1: stride,
                    w0: w0 + (OW - 1) * stride + 1: stride]     # (N, Cin, OH, OW)
            taps.append(sl.reshape(N, Cin, OHW))
    patches = jnp.concatenate(taps, axis=1)                      # (N, K, OHW)
    patches = jnp.pad(patches, ((0, 0), (0, 0), (0, OHWp - OHW)))

    # weight [Cout, Cin, KH, KW] -> [Cout, KH, KW, Cin] -> [Coutp, K]  (K unpadded)
    wT = jnp.transpose(weight, (0, 2, 3, 1)).reshape(Cout, K).astype(jnp.bfloat16)
    wT = jnp.pad(wT, ((0, Coutp - Cout), (0, 0)))

    # ---- Kernel A: conv matmul (weight resident, full K) + per-tile stats ----
    vmem_a = _a_bytes(tm)
    y, s_part, q_part = pl.pallas_call(
        _conv_stats_kernel,
        out_shape=(jax.ShapeDtypeStruct((N, Coutp, OHWp), jnp.bfloat16),
                   jax.ShapeDtypeStruct((N, n_m, Coutp, 1), jnp.float32),
                   jax.ShapeDtypeStruct((N, n_m, Coutp, 1), jnp.float32)),
        grid_spec=pltpu.PrefetchScalarGridSpec(
            num_scalar_prefetch=0,
            grid=(N, n_m),
            in_specs=[pl.BlockSpec((None, K, tm), lambda n, j: (n, 0, j)),
                      pl.BlockSpec((Coutp, K), lambda n, j: (0, 0))],
            out_specs=(pl.BlockSpec((None, Coutp, tm), lambda n, j: (n, 0, j)),
                       pl.BlockSpec((None, None, Coutp, 1), lambda n, j: (n, j, 0, 0)),
                       pl.BlockSpec((None, None, Coutp, 1), lambda n, j: (n, j, 0, 0)))),
        compiler_params=pltpu.CompilerParams(
            dimension_semantics=("parallel", "parallel"),
            vmem_limit_bytes=int(min(48 << 20, max(16 << 20, 2 * vmem_a)))),
    )(patches, wT)

    # ---- fold BatchNorm (training mode: biased batch var) into scale/shift ----
    # Zero-padded OHW columns / Cout channels contribute 0; divide by true M.
    s = jnp.sum(s_part, axis=(0, 1))            # (Coutp, 1)
    q = jnp.sum(q_part, axis=(0, 1))            # (Coutp, 1)
    mean = s / M
    var = jnp.maximum(q / M - mean * mean, 0.0)  # clamp f32 cancellation
    gamma_p = jnp.pad(gamma.astype(jnp.float32), (0, Coutp - Cout)).reshape(Coutp, 1)
    beta_p = jnp.pad(beta.astype(jnp.float32), (0, Coutp - Cout)).reshape(Coutp, 1)
    scale = gamma_p * lax.rsqrt(var + eps)
    shift = beta_p - mean * scale

    # ---- Kernel B: BN + ReLU, writes final (N, Coutp, OHWp) layout directly ----
    tmb = tm
    while (OHWp % (tmb * 2) == 0 and tmb * 2 <= 16384
           and (N >= 2 or OHWp // (tmb * 2) >= 2)):
        tmb *= 2
    n_mb = OHWp // tmb
    vmem_b = 2 * (Coutp * tmb * (2 + 4)) + 4 * Coutp * 128 * 4
    out_full = pl.pallas_call(
        _bn_relu_kernel,
        out_shape=jax.ShapeDtypeStruct((N, Coutp, OHWp), jnp.float32),
        grid_spec=pltpu.PrefetchScalarGridSpec(
            num_scalar_prefetch=0,
            grid=(N, n_mb),
            in_specs=[pl.BlockSpec((None, Coutp, tmb), lambda n, j: (n, 0, j)),
                      pl.BlockSpec((Coutp, 1), lambda n, j: (0, 0)),
                      pl.BlockSpec((Coutp, 1), lambda n, j: (0, 0))],
            out_specs=pl.BlockSpec((None, Coutp, tmb), lambda n, j: (n, 0, j))),
        compiler_params=pltpu.CompilerParams(
            dimension_semantics=("parallel", "parallel"),
            vmem_limit_bytes=int(min(48 << 20, max(16 << 20, 2 * vmem_b)))),
    )(y, scale, shift)

    # already NCHW-ordered: just drop padding and reshape (no transpose pass)
    return out_full[:, :Cout, :OHW].reshape(N, Cout, OH, OW)


if __name__ == "__main__":
    key = jax.random.PRNGKey(0)
    kx, kw = jax.random.split(key)

    # BasicConv(in_channels=4, out_channels=8, kernel_size=3, stride=1, padding=1)
    N, Cin, H, W = 2, 4, 16, 16
    Cout, KH, KW = 8, 3, 3
    stride, padding, dilation = 1, 1, 1

    x = jax.random.normal(kx, (N, Cin, H, W), dtype=jnp.float32)
    weight = jax.random.normal(kw, (Cout, Cin, KH, KW), dtype=jnp.float32) * 0.1
    gamma = jnp.ones((Cout,), jnp.float32)   # nn.BatchNorm2d default weight init
    beta = jnp.zeros((Cout,), jnp.float32)   # nn.BatchNorm2d default bias init

    out = basic_conv(x, weight, gamma, beta,
                     stride=stride, padding=padding, dilation=dilation)
    out = jax.block_until_ready(out)

    # reference check (plain JAX / XLA conv, f32)
    ref_conv = lax.conv_general_dilated(
        x, weight, window_strides=(stride, stride),
        padding=[(padding, padding), (padding, padding)],
        rhs_dilation=(dilation, dilation),
        dimension_numbers=("NCHW", "OIHW", "NCHW"))
    m = ref_conv.mean(axis=(0, 2, 3), keepdims=True)
    v = ref_conv.var(axis=(0, 2, 3), keepdims=True)
    ref = (ref_conv - m) / jnp.sqrt(v + 1e-5)
    ref = ref * gamma.reshape(1, -1, 1, 1) + beta.reshape(1, -1, 1, 1)
    ref = jnp.maximum(ref, 0.0)

    assert out.shape == (N, Cout, H, W)
    assert jnp.allclose(out, ref, atol=2e-2, rtol=2e-2)
    print("KERNEL_OK")
</pallas_src>

<mosaic_0001>
module attributes {stable_mosaic.version = 11 : i64} {
  func.func @_conv_stats_kernel(%arg0: i32, %arg1: i32, %arg2: memref<1x36x256xbf16, #tpu.memory_space<vmem>>, %arg3: memref<8x36xbf16, #tpu.memory_space<vmem>>, %arg4: memref<1x8x256xbf16, #tpu.memory_space<vmem>>, %arg5: memref<1x1x8x1xf32, #tpu.memory_space<vmem>>, %arg6: memref<1x1x8x1xf32, #tpu.memory_space<vmem>>) attributes {dimension_semantics = [#tpu.dimension_semantics<parallel>, #tpu.dimension_semantics<parallel>], iteration_bounds = array<i64: 2, 1>, scalar_prefetch = 0 : i64, scratch_operands = 0 : i64, tpu.core_type = #tpu.core_type<tc>, window_params = [{transform_indices = @transform_0, window_bounds = array<i64: 1, 36, 256>}, {pipeline_mode = #tpu.pipeline_mode<synchronous>, transform_indices = @transform_1, window_bounds = array<i64: 8, 36>}, {transform_indices = @transform_2, window_bounds = array<i64: 1, 8, 256>}, {transform_indices = @transform_3, window_bounds = array<i64: 1, 1, 8, 1>}, {transform_indices = @transform_4, window_bounds = array<i64: 1, 1, 8, 1>}]} {
    %c0 = arith.constant 0 : index
    %c0_0 = arith.constant 0 : index
    %0 = vector.load %arg3[%c0, %c0_0] : memref<8x36xbf16, #tpu.memory_space<vmem>>, vector<8x36xbf16>
    %c0_1 = arith.constant 0 : index
    %c0_2 = arith.constant 0 : index
    %c0_3 = arith.constant 0 : index
    %1 = vector.load %arg2[%c0_1, %c0_2, %c0_3] : memref<1x36x256xbf16, #tpu.memory_space<vmem>>, vector<1x36x256xbf16>
    %2 = vector.shape_cast %1 : vector<1x36x256xbf16> to vector<36x256xbf16>
    %cst = arith.constant dense<0.000000e+00> : vector<8x256xf32>
    %3 = tpu.matmul %0, %2, %cst {dimension_numbers = #tpu.dot_dimension_numbers<[1], [0], [0], [1], [0, 0, 1, 1], [], []>} : vector<8x36xbf16>, vector<36x256xbf16>, vector<8x256xf32> -> vector<8x256xf32>
    %4 = arith.truncf %3 : vector<8x256xf32> to vector<8x256xbf16>
    %c0_4 = arith.constant 0 : index
    %c0_5 = arith.constant 0 : index
    %c0_6 = arith.constant 0 : index
    %5 = vector.load %arg4[%c0_4, %c0_5, %c0_6] : memref<1x8x256xbf16, #tpu.memory_space<vmem>>, vector<1x8x256xbf16>
    %6 = vector.shape_cast %5 : vector<1x8x256xbf16> to vector<8x256xbf16>
    %7 = vector.shape_cast %4 : vector<8x256xbf16> to vector<1x8x256xbf16>
    tpu.vector_store %arg4[%c0_4, %c0_5, %c0_6], %7 {strides = array<i32>} : memref<1x8x256xbf16, #tpu.memory_space<vmem>>, vector<1x8x256xbf16>,
    %cst_7 = arith.constant 0.000000e+00 : f32
    %8 = vector.broadcast %cst_7 : f32 to vector<8x1xf32>
    %cst_8 = arith.constant 0.000000e+00 : f32
    %9 = vector.broadcast %cst_8 : f32 to vector<8x1xf32>
    %cst_9 = arith.constant dense<0.000000e+00> : vector<8xf32>
    %10 = vector.multi_reduction <add>, %3, %cst_9 [1] : vector<8x256xf32> to vector<8xf32>
    %11 = vector.shape_cast %10 : vector<8xf32> to vector<8x1xf32>
    %12 = arith.addf %8, %11 : vector<8x1xf32>
    %13 = arith.mulf %3, %3 : vector<8x256xf32>
    %cst_10 = arith.constant dense<0.000000e+00> : vector<8xf32>
    %14 = vector.multi_reduction <add>, %13, %cst_10 [1] : vector<8x256xf32> to vector<8xf32>
    %15 = vector.shape_cast %14 : vector<8xf32> to vector<8x1xf32>
    %16 = arith.addf %9, %15 : vector<8x1xf32>
    %c0_11 = arith.constant 0 : index
    %c0_12 = arith.constant 0 : index
    %c0_13 = arith.constant 0 : index
    %c0_14 = arith.constant 0 : index
    %17 = vector.load %arg5[%c0_11, %c0_12, %c0_13, %c0_14] : memref<1x1x8x1xf32, #tpu.memory_space<vmem>>, vector<1x1x8x1xf32>
    %18 = vector.shape_cast %17 : vector<1x1x8x1xf32> to vector<8x1xf32>
    %19 = vector.shape_cast %12 : vector<8x1xf32> to vector<1x1x8x1xf32>
    tpu.vector_store %arg5[%c0_11, %c0_12, %c0_13, %c0_14], %19 {strides = array<i32>} : memref<1x1x8x1xf32, #tpu.memory_space<vmem>>, vector<1x1x8x1xf32>,
    %c0_15 = arith.constant 0 : index
    %c0_16 = arith.constant 0 : index
    %c0_17 = arith.constant 0 : index
    %c0_18 = arith.constant 0 : index
    %20 = vector.load %arg6[%c0_15, %c0_16, %c0_17, %c0_18] : memref<1x1x8x1xf32, #tpu.memory_space<vmem>>, vector<1x1x8x1xf32>
    %21 = vector.shape_cast %20 : vector<1x1x8x1xf32> to vector<8x1xf32>
    %22 = vector.shape_cast %16 : vector<8x1xf32> to vector<1x1x8x1xf32>
    tpu.vector_store %arg6[%c0_15, %c0_16, %c0_17, %c0_18], %22 {strides = array<i32>} : memref<1x1x8x1xf32, #tpu.memory_space<vmem>>, vector<1x1x8x1xf32>,
    return
  }
  func.func @transform_0(%arg0: i32, %arg1: i32) -> (i32, i32, i32) {
    %c0_i32 = arith.constant 0 : i32
    %c0_i32_0 = arith.constant 0 : i32
    return %arg0, %c0_i32, %arg1 : i32, i32, i32
  }
  func.func @transform_1(%arg0: i32, %arg1: i32) -> (i32, i32) {
    %c0_i32 = arith.constant 0 : i32
    %c0_i32_0 = arith.constant 0 : i32
    %c0_i32_1 = arith.constant 0 : i32
    return %c0_i32, %c0_i32_0 : i32, i32
  }
  func.func @transform_2(%arg0: i32, %arg1: i32) -> (i32, i32, i32) {
    %c0_i32 = arith.constant 0 : i32
    %c0_i32_0 = arith.constant 0 : i32
    return %arg0, %c0_i32, %arg1 : i32, i32, i32
  }
  func.func @transform_3(%arg0: i32, %arg1: i32) -> (i32, i32, i32, i32) {
    %c0_i32 = arith.constant 0 : i32
    %c0_i32_0 = arith.constant 0 : i32
    %c0_i32_1 = arith.constant 0 : i32
    return %arg0, %arg1, %c0_i32, %c0_i32_0 : i32, i32, i32, i32
  }
  func.func @transform_4(%arg0: i32, %arg1: i32) -> (i32, i32, i32, i32) {
    %c0_i32 = arith.constant 0 : i32
    %c0_i32_0 = arith.constant 0 : i32
    %c0_i32_1 = arith.constant 0 : i32
    return %arg0, %arg1, %c0_i32, %c0_i32_0 : i32, i32, i32, i32
  }
}

</mosaic_0001>

<bundles_post_ra>
// kernel: tpu_custom_call.1
= control target key start
LH: loop header
LB: loop body
LE: loop exit
PB: predicated region body
PF: predicated region fallthrough
CT: control target
= control target key end

     0   :  { %10 = vsyncpa [#allocation3], 0  ;;  %s861_s0 = inlined_call_operand.vmem [shape: bf16[2,36,256], index: 0, kind: input, shape index: {}]   ;;  %s862_s1 = inlined_call_operand.vmem [shape: bf16[8,36], index: 1, kind: input, shape index: {}]   ;;  %s863_s2 = inlined_call_operand.hbm [shape: bf16[2,8,256], index: 2, kind: output, shape index: {0}]   ;;  %s864_s3 = inlined_call_operand.vmem [shape: f32[2,1,8,1], index: 3, kind: output, shape index: {1}]   ;;  %s865_s4 = inlined_call_operand.vmem [shape: f32[2,1,8,1], index: 4, kind: output, shape index: {2}]  }
   0x1   :  { %12 = vsyncpa [#allocation3 + $0x1], 0  ;;  %s742_s15 = smov 0   ;;  %s744_s16 = smov 0  }
   0x2   :  { %s746_s17 = smov 0   ;;  %s748_s18 = smov 0  }
   0x3   :  { %s750_s19 = smov 0   ;;  %s752_s20 = smov 0  }
   0x4 LB: > { %s545_s21 = sadd.s32 4294967295, %s713_s20   ;;  %s546_s22 = sadd.s32 4294967294, %s713_s20   ;;  %s713_s20 = sphi %s752_s20, %s18_s20   ;;  %s709_s19 = sphi %s750_s19, %s872_s19   ;;  %s705_s18 = sphi %s748_s18, %s871_s18   ;;  %s701_s17 = sphi %s746_s17, %s870_s17   ;;  %s697_s16 = sphi %s744_s16, %s869_s16   ;;  %s693_s15 = sphi %s742_s15, %s868_s15  }
   0x5   : > { %s30_s23 = sadd.s32 1, %s709_s19  ;;  %s88_s24 = sadd.s32 1, %s701_s17 }
   0x6   : > { %p32_p0 = scmp.ge.s32.totalorder %s30_s23, 2  ;;  %p98_p1 = scmp.ne.s32.totalorder %s701_s17, %s697_s16 }
   0x7   : > { %p99_p2 = scmp.eq.s32.totalorder %s545_s21, 1  ;;  %p104_p3 = scmp.ne.s32.totalorder %s697_s16, %s693_s15 }
   0x8   : > { %s874_s23 = smov (%p32_p0, %s30_s23), 0  ;;  %p105_p5 = scmp.eq.s32.totalorder %s546_s22, 1 }
   0x9   : > { %p782_p4 = por %p99_p2, %p98_p1  ;;  %s83_s26 = ssub.s32 %s709_s19, %s874_s23 }
   0xa   : > { %p549_p6 = scmp.ge.s32.totalorder %s713_s20, 1  ;;  %p86_p7 = scmp.eq.s32.totalorder %s83_s26, 0 }
   0xb   : > { %p789_p8 = por %p105_p5, %p104_p3  ;;  %p195_p9 = scmp.lt.s32.totalorder %s713_s20, 3 }
   0xc   : > { %s795_s28 = scalar_select %p86_p7, %s701_s17, %s88_s24  }
   0xd   : > { %p196_p10 = pnand %p549_p6, %p195_p9 }
   0xe   : > { %p240_p11 = scmp.lt.s32.totalorder (!%p196_p10), %s705_s18, 1  ;;  %v715_v0 = vmov (!%p196_p10), 0   ;;  %vm300_vm0 = vcmask (!%p196_p10), 1041408   ;;  %v265_v9 = vld [vmem:[%s862_s1] sm:$0xf] (!%p196_p10)  ;;  %vm296_vm1 = vcmask (!%p196_p10), 293888  }
   0xf   : > { %199 = sbr.rel (%p196_p10) target bundleno = 402 (0x192), region = 28  ;;  %339 = vmatprep.mubr.bf16.mxu0 (!%p196_p10), %v715_v0  ;;  %s218_s10 = sand.u32 (!%p196_p10), 1, %s697_s16  }
  0x10   : > { %s550_s11 = sshll.u32 (!%p196_p10), %s218_s10, 3  ;;  %s569_s13 = sshll.u32 (!%p196_p10), %s705_s18, 7 }
  0x11   : > { %s220_s12 = scalar_lea.vmem (!%p196_p10), [#allocation2], %s550_s11  ;;  %s813_s24 = scalar_lea.hbm (!%p196_p10), %s863_s2, %s569_s13 }
  0x12   : > { %s401_s14 = sshll.u32 (!%p196_p10), %s220_s12, 4  ;;  %s371_s26 = scalar_lea.sflag (!%p196_p10), [#allocation3], %s218_s10  ;;  %s402_s14 = int_to_ptr.vmem [resolvable:$true] %s401_s14 }
  0x13   : > { %s716_s5 = smov (!%p196_p10), [#allocation2]  }
  0x14   : > { %s639_s6 = sshll.u32 (!%p196_p10), %s716_s5, 4  ;;  %s640_s6 = int_to_ptr.vmem [resolvable:$false] %s639_s6 }
  0x15   : > { %p642_p1 = scmp.lt.s32.totalorder (!%p196_p10), %s402_s14, %s640_s6 }
  0x16   : > { %s799_s29 = scalar_select %p240_p11, %s705_s18, 1 }
  0x18   : > { %s570_s30 = smul.u32 40, %s799_s29 }
  0x1a   : > { %s247_s7 = scalar_lea.vmem %s861_s0, %s570_s30  ;;  %s635_s30 = scalar_lea.vmem %s402_s14, 128 }
  0x1b   : > { %v627_v1 = vld [vmem:[%s247_s7 + $0x4] ss:$8 sps:$4 sm:$0xff]   ;;  %v629_v2 = vld [vmem:[%s247_s7] ss:$8 sps:$4 sm:$0xff]   ;;  %v630_v3 = vld [vmem:[%s247_s7 + $0x14] ss:$8 sps:$4 sm:$0xff]   ;;  %p636_p12 = scmp.ne.s32.totalorder %s402_s14, %s635_s30 }
  0x1c   : > { %307 = vmatprep.subr.bf16.mxu0 %v627_v1  ;;  %v270_v4 = vld [vmem:[%s247_s7 + $0x20] sm:$0x33]  ;;  %v632_v5 = vld [vmem:[%s247_s7 + $0x10] ss:$8 sps:$4 sm:$0xff]   ;;  %s641_s7 = scalar_lea.vmem %s640_s6, 256 }
  0x1d   : > { %308 = vmatpush1.bf16.msra.mxu0 %v629_v2  ;;  %v559_v6 = vcombine.high %v270_v4, %v270_v4  ;;  %v558_v7 = vcombine.low %v270_v4, %v270_v4  ;;  %p637_p13 = pnand %p636_p12, %p782_p4  ;;  %p643_p2 = scmp.lt.s32.totalorder %s641_s7, %s635_s30 }
  0x1e   : > { %309 = vmatprep.subr.bf16.mxu0 %v630_v3 }
  0x1f   : > { %v302_v8 = vsel %vm300_vm0, %v558_v7, 0  ;;  %p638_p0 = pneg %p637_p13  ;;  %p644_p3 = por %p643_p2, %p642_p1 }
  0x21   : > { %310 = vmatpush1.bf16.msra.mxu0 %v632_v5  ;;  %p645_p5 = pnand %p644_p3, %p638_p0 }
  0x22   : > { %560 = vmatprep.subr.msk.bf16.mxu0 %vm300_vm0, %v559_v6 }
  0x25   : > { %312 = vmatpush1.bf16.msra.mxu0 %v302_v8 }
  0x28   : > { %561 = vmatmul.mubr.msk.bf16.vlgmr.msra.gmra.mrb[0].mxu0 %vm296_vm1, %v265_v9 }
  0xfb   : > { %v341_v10 = vpop.f32.mrb[0].mxu0 }
  0xfc   : > { %v343_v11 = vpop.f32.mrb[1].mxu0  ;;  %v361_v12 = vmul.f32 %v341_v10, %v341_v10 }
  0xfd   : > { %v568_v13 = vpack.c.bf16 %v343_v11, %v341_v10  ;;  %v345_v14 = vpop.f32.mrb[2].mxu0  ;;  %v357_v15 = vadd.f32 %v343_v11, %v341_v10  ;;  %v362_v16 = vmul.f32 %v343_v11, %v343_v11 }
  0xfe   : > { %v346_v17 = vpop.f32.mrb[3].mxu0 }
  0xff   : > { %358 = vadd.xlane.f32.xlu0 %v357_v15  ;;  %v363_v18 = vadd.f32 %v362_v16, %v361_v12  ;;  %356 = vst [vmem:[%s220_s12] sm:$0xff] %v568_v13 }
 0x103   : > { %364 = vadd.xlane.f32.xlu0 %v363_v18 }
 0x104   : > { %648 = shalt.err (!%p645_p5)
}
 0x105   : > { %s649_s18 = scalar_lea.hbm %s813_s24, 128  ;;  %s653_s10 = scalar_lea.hbm %s863_s2, 256 }
 0x106   : > { %p650_p6 = scmp.ne.s32.totalorder %s813_s24, %s649_s18  ;;  %p654_p10 = scmp.lt.u32.totalorder %s813_s24, %s863_s2 }
 0x107   : > { %p655_p11 = scmp.lt.u32.totalorder %s653_s10, %s649_s18  ;;  %p657_p13 = scmp.lt.u32.totalorder %s649_s18, %s813_s24 }
 0x108   : > { %p651_p7 = pnand %p650_p6, %p782_p4 }
 0x109   : > { %p656_p12 = por %p655_p11, %p654_p10 }
 0x10a   : > { %p652_p9 = pneg %p651_p7 }
 0x10b   : > { %p658_p0 = por %p657_p13, %p656_p12 }
 0x10d   : > { %p659_p1 = pnand %p658_p0, %p652_p9 }
 0x10f   : > { %662 = shalt.err (!%p659_p1)
}
 0x110   : > { %571 = dma.vmem_to_hbm [thread:$0]  (%p782_p4), %s402_s14, 128, %s813_s24, %s371_s26   ;;  %vm367_vm2 = vcmask 7168  }
 0x111   : > { %s552_s13 = sshll.u32 %s799_s29, 3 }
 0x112   : > { %s256_s30 = scalar_lea.vmem %s864_s3, %s552_s13  ;;  %s263_s7 = scalar_lea.vmem %s865_s4, %s552_s13 }
 0x18c   : > { %v359_v19 = vpop.xlane.xlu0 %358 }
 0x18d   : > { %368 = vst.msk [vmem:[%s256_s30] sm:$0xff] %vm367_vm2, %v359_v19 }
 0x190   : > { %v365_v20 = vpop.xlane.xlu0 %364 }
 0x191   : > { %369 = vst.msk [vmem:[%s263_s7] sm:$0xff] %vm367_vm2, %v365_v20 }
 0x192 PF: > { %p577_p2 = scmp.ge.s32.totalorder %s713_s20, 2  ;;  %s419_s25 = sand.u32 1, %s693_s15  }
 0x193   : > { %s420_s29 = scalar_lea.sflag [#allocation3], %s419_s25 }
 0x194   : > { %p574_p4 = pnand %p577_p2, %p789_p8 }
 0x196   : > { %688 = dma.done.wait (!%p574_p4), %s420_s29, 128  }
 0x197   : > { %690 = vsyncadd (!%p574_p4), %s420_s29, 4294967168  ;;  %s18_s20 = sadd.s32 1, %s713_s20   ;;  %s868_s15 = smov %s697_s16 }
 0x198   : > { %p15_p3 = scmp.ge.s32.totalorder %s18_s20, 4   ;;  %s869_s16 = smov %s701_s17 }
 0x199   : > { %s870_s17 = smov %s795_s28  ;;  %s871_s18 = smov %s709_s19 }
 0x19a   : > { %s872_s19 = smov %s874_s23  ;;  %17 = sbr.rel (!%p15_p3) target bundleno = 4 (0x4), region = 87 }
 0x1a1   :  { %445 = vsyncpa [#allocation3], 1 }
 0x1a2   :  { %447 = vsyncpa [#allocation3 + $0x1], 1 }

</bundles_post_ra>
